<compile_context>
chip_gen: v7x
topology: tpu7x:2x2x1
jax: 0.10.0
libtpu: 0.0.40
codegen_flags: <defaults>
</compile_context>

<pallas_src>
import functools

import jax
import jax.numpy as jnp
from jax import lax
from jax.experimental import pallas as pl
from jax.experimental.pallas import tpu as pltpu

_LANES = 128
_SUBLANES = 8
_MAX_BLOCK_ROWS = 8192                    # 8192*128*4B = 4 MiB per f32 stream/buffer.
_VMEM_LIMIT_BYTES = 48 * 1024 * 1024      # <=48 MiB: >=16 MiB headroom on v7x's 64 MiB.
_STREAM_DTYPES = (jnp.dtype(jnp.float32), jnp.dtype(jnp.bfloat16), jnp.dtype(jnp.float16))


def _round_up(x, m):
    return (x + m - 1) // m * m


def _num_tensorcores():
    """Size of the leading 'parallel' grid axis: 2 on megacore chips
    (v7x / v4 / v5p), 1 on single-TensorCore chips (v5e / v6e).  Defensive
    default of 1 (always correct, just no cross-core sharding)."""
    try:
        dev = jax.devices()[0]
        if dev.platform != "tpu":
            return 1
        kind = dev.device_kind.lower()
    except Exception:  # pragma: no cover - defensive
        return 1
    if "lite" in kind or "v5e" in kind or "v6e" in kind:
        return 1
    if "v7" in kind or "7x" in kind or "v4" in kind or "v5p" in kind:
        return 2
    return 1


def _loss_block(o_ref, t_ref, w_ref, w_mode):
    """Per-block BCE loss in f32 (inputs may be bf16/f16 and are upcast here)."""
    o = o_ref[...].astype(jnp.float32)
    t = t_ref[...].astype(jnp.float32)
    # Clamp each log term at -100 (finite even at o in {0,1}); log1p for
    # precision near o == 1.  Matches the module exactly for o in (0, 1).
    log_o = jnp.maximum(jnp.log(o), -100.0)
    log_1mo = jnp.maximum(jnp.log1p(-o), -100.0)
    loss = t * log_o + (1.0 - t) * log_1mo
    if w_mode == "full":
        loss = w_ref[...].astype(jnp.float32) * loss
    return loss


def _bce_body(o_ref, t_ref, w_ref, acc_ref, *, w_mode, n_valid, block_rows,
              total_blocks, needs_mask, has_overhang):
    c = pl.program_id(0)
    i = pl.program_id(1)
    block = c * pl.num_programs(1) + i

    @pl.when(i == 0)
    def _init():
        acc_ref[...] = jnp.zeros_like(acc_ref)

    def accumulate(loss):
        if w_mode == "row":
            # Lane-dense per-row weights applied via an otherwise-idle MXU:
            #   (1, block_rows) @ (block_rows, 128) -> (1, 128).
            w = w_ref[...].reshape(1, block_rows)
            contrib = jnp.dot(w, loss, preferred_element_type=jnp.float32)
            acc_ref[...] += contrib.reshape(1, 1, _LANES)
        else:
            # Fold onto an (8,128) vreg-shaped accumulator: pure VPU adds,
            # no per-step cross-lane reduction.
            partial = jnp.sum(loss.reshape(-1, _SUBLANES, _LANES), axis=0)
            acc_ref[...] += partial.reshape(1, _SUBLANES, _LANES)

    def process_block():
        loss = _loss_block(o_ref, t_ref, w_ref, w_mode)
        if needs_mask:
            # Mask cost (iotas / compare / select) only runs on the single
            # last real block; interior blocks accumulate unmasked.
            if total_blocks > 1:
                @pl.when(block < total_blocks - 1)
                def _interior():
                    accumulate(loss)

            @pl.when(block == total_blocks - 1)
            def _last():
                row0 = (total_blocks - 1) * block_rows          # static
                ridx = row0 + lax.broadcasted_iota(jnp.int32, loss.shape, 0)
                lidx = lax.broadcasted_iota(jnp.int32, loss.shape, 1)
                flat = ridx * _LANES + lidx
                accumulate(jnp.where(flat < n_valid, loss, 0.0))
        else:
            accumulate(loss)

    if has_overhang:
        # Second core's clamped overhang block: skip compute entirely so the
        # re-read last block is never double counted.
        @pl.when(block < total_blocks)
        def _valid():
            process_block()
    else:
        process_block()


def _bce_kernel_none(o_ref, t_ref, acc_ref, **kw):
    _bce_body(o_ref, t_ref, None, acc_ref, w_mode="none", **kw)


def _bce_kernel_full(o_ref, t_ref, w_ref, acc_ref, **kw):
    _bce_body(o_ref, t_ref, w_ref, acc_ref, w_mode="full", **kw)


def _bce_kernel_row(o_ref, t_ref, w_ref, acc_ref, **kw):
    _bce_body(o_ref, t_ref, w_ref, acc_ref, w_mode="row", **kw)


def _per_row_weights(weights, out_shape):
    """If `weights` (broadcast against `out_shape`) is constant over every
    contiguous run of 128 flattened elements, return a flat (rows,) f32 per-row
    weight vector; otherwise return None (caller falls back to full weights)."""
    w = jnp.asarray(weights, jnp.float32)
    if w.ndim > len(out_shape):
        return None
    w_shape = (1,) * (len(out_shape) - w.ndim) + tuple(w.shape)
    trailing = 1
    k = len(out_shape)
    while k > 0 and w_shape[k - 1] == 1:
        trailing *= out_shape[k - 1]
        k -= 1
    if trailing % _LANES != 0:
        return None
    lead_shape = tuple(out_shape[:k])
    w_lead = jnp.broadcast_to(w.reshape(w_shape[:k]), lead_shape).ravel()
    rows_per_lead = trailing // _LANES
    return jnp.repeat(w_lead, rows_per_lead)          # n // 128 floats total


def bce_with_weights(output, target, weights=None, *,
                     max_block_rows=_MAX_BLOCK_ROWS, num_cores=None):
    """Pallas-backed equivalent of BCE_with_Weights(weights)(output, target)."""
    output = jnp.asarray(output)
    target = jnp.asarray(target)
    assert output.shape == target.shape, (output.shape, target.shape)
    if output.dtype not in _STREAM_DTYPES:
        output = output.astype(jnp.float32)
    if target.dtype not in _STREAM_DTYPES:
        target = target.astype(jnp.float32)
    n = output.size

    # ---- weight strategy ---------------------------------------------------
    w_mode, w_scalar, w_rows, w_full = "none", None, None, None
    if weights is not None:
        w_arr = jnp.asarray(weights)
        if w_arr.size == 1:
            w_mode = "scalar"
            w_scalar = w_arr.astype(jnp.float32).reshape(())
        else:
            w_rows = _per_row_weights(w_arr, output.shape)
            if w_rows is not None:
                w_mode = "row"
            else:
                # TODO(synk): handle weights that are periodic *within* a
                # 128-lane row in-kernel to avoid materializing this broadcast.
                w_mode = "full"
                w_full = jnp.broadcast_to(w_arr, output.shape)
                if w_full.dtype not in _STREAM_DTYPES:
                    w_full = w_full.astype(jnp.float32)

    # ---- flatten into lane-dense (rows, 128) slabs ---------------------------
    o_flat = output.ravel()
    t_flat = target.ravel()
    pad = (-n) % _LANES
    if pad:
        # (o=1, t=1) gives exactly zero loss under the -100 clamp, so the
        # ragged lane tail never needs in-kernel masking.
        o_flat = jnp.pad(o_flat, (0, pad), constant_values=1.0)
        t_flat = jnp.pad(t_flat, (0, pad), constant_values=1.0)
    rows = (n + pad) // _LANES
    o2 = o_flat.reshape(rows, _LANES)
    t2 = t_flat.reshape(rows, _LANES)
    w_full2 = None
    if w_mode == "full":
        w_flat = w_full.ravel()
        if pad:
            w_flat = jnp.pad(w_flat, (0, pad))
        w_full2 = w_flat.reshape(rows, _LANES)

    # ---- tiling --------------------------------------------------------------
    streams = [o2, t2] + ([w_full2] if w_mode == "full" else [])
    mult = _SUBLANES
    if any(a.dtype != jnp.dtype(jnp.float32) for a in streams):
        mult = 2 * _SUBLANES              # 16-row sublane packing for bf16/f16.
    block_rows = min(max_block_rows, _round_up(rows, mult))
    block_rows = max(mult, block_rows // mult * mult)
    total_blocks = pl.cdiv(rows, block_rows)

    if num_cores is None:
        num_cores = _num_tensorcores()
    num_cores = max(1, min(int(num_cores), total_blocks))
    blocks_per_core = pl.cdiv(total_blocks, num_cores)
    has_overhang = num_cores * blocks_per_core > total_blocks
    needs_mask = total_blocks * block_rows != rows    # garbage rows past the edge

    def data_map(c, i):
        # Clamp so edge/overhang blocks never DMA a fully out-of-bounds tile;
        # overhang blocks are skipped in-kernel, the last block is masked.
        return (jnp.minimum(c * blocks_per_core + i, total_blocks - 1), 0)

    data_spec = pl.BlockSpec((block_rows, _LANES), data_map)
    in_specs = [data_spec, data_spec]
    inputs = [o2, t2]

    static_kw = dict(n_valid=n, block_rows=block_rows, total_blocks=total_blocks,
                     needs_mask=needs_mask, has_overhang=has_overhang)

    if w_mode == "row":
        rows_padded = total_blocks * block_rows
        w_vec = w_rows
        if rows_padded != rows:
            w_vec = jnp.pad(w_vec, (0, rows_padded - rows))   # zero weight pad
        w2d = w_vec.reshape(total_blocks, 1, block_rows)      # lane-dense slabs
        inputs.append(w2d)
        in_specs.append(pl.BlockSpec(
            (1, 1, block_rows),
            lambda c, i: (jnp.minimum(c * blocks_per_core + i, total_blocks - 1), 0, 0)))
        kernel = functools.partial(_bce_kernel_row, **static_kw)
        acc_rows = 1
    elif w_mode == "full":
        inputs.append(w_full2)
        in_specs.append(data_spec)
        kernel = functools.partial(_bce_kernel_full, **static_kw)
        acc_rows = _SUBLANES
    else:  # "none" or "scalar"
        kernel = functools.partial(_bce_kernel_none, **static_kw)
        acc_rows = _SUBLANES

    out_shape = jax.ShapeDtypeStruct((num_cores, acc_rows, _LANES), jnp.float32)
    out_spec = pl.BlockSpec((1, acc_rows, _LANES), lambda c, i: (c, 0, 0))

    partials = pl.pallas_call(
        kernel,
        out_shape=out_shape,
        grid=(num_cores, blocks_per_core),
        in_specs=in_specs,
        out_specs=out_spec,
        compiler_params=pltpu.CompilerParams(
            dimension_semantics=("parallel", "arbitrary"),
            vmem_limit_bytes=_VMEM_LIMIT_BYTES),
    )(*inputs)

    # Final tiny reduce + mean + negate as JAX glue.
    result = -jnp.sum(partials) / jnp.float32(n)
    if w_mode == "scalar":
        result = w_scalar * result
    return result


def _reference(output, target, weights=None):
    o = jnp.asarray(output, jnp.float32)
    t = jnp.asarray(target, jnp.float32)
    loss = t * jnp.log(o) + (1.0 - t) * jnp.log(1.0 - o)
    if weights is not None:
        loss = jnp.asarray(weights, jnp.float32) * loss
    return -jnp.mean(loss)


def _check(name, got, want, tol=1e-5):
    got = jax.block_until_ready(got)
    assert jnp.allclose(got, want, rtol=tol, atol=tol), (name, got, want)


if __name__ == "__main__":
    key = jax.random.PRNGKey(0)
    k1, k2, k3, k4 = jax.random.split(key, 4)

    shape = (2, 4, 16, 16)  # NCHW
    # output must be strictly in (0, 1) for the logs to be finite.
    output = jax.nn.sigmoid(jax.random.normal(k1, shape, dtype=jnp.float32))
    target = jax.random.uniform(k2, shape, dtype=jnp.float32)
    w_chan = jnp.array([0.5, 1.0, 1.5, 2.0], jnp.float32).reshape(1, 4, 1, 1)

    # 1) per-channel broadcast weights -> lane-dense per-row weights via MXU matvec.
    _check("row", bce_with_weights(output, target, w_chan),
           _reference(output, target, w_chan))

    # 2) full-shape weights -> 3-stream elementwise path.
    w_full = jnp.broadcast_to(w_chan, shape)
    _check("full", bce_with_weights(output, target, w_full),
           _reference(output, target, w_full))

    # 3) weights=None -> specialized 2-input kernel.
    _check("none", bce_with_weights(output, target),
           _reference(output, target))

    # 4) scalar weight -> unweighted kernel + scalar rescale (no weight stream).
    _check("scalar", bce_with_weights(output, target, 0.7),
           _reference(output, target, 0.7))

    # 5) bf16 inputs stream at native width, upcast to f32 in-kernel.
    o16 = jnp.clip(output, 0.01, 0.99).astype(jnp.bfloat16)
    t16 = target.astype(jnp.bfloat16)
    _check("bf16", bce_with_weights(o16, t16), _reference(o16, t16))

    # 6) multi-block grid + forced 2-core split with an overhang block (skip path).
    shape6 = (3, 4, 16, 16)
    o6 = jax.nn.sigmoid(jax.random.normal(k3, shape6, dtype=jnp.float32))
    t6 = jax.random.uniform(k4, shape6, dtype=jnp.float32)
    _check("multi", bce_with_weights(o6, t6, w_chan, max_block_rows=8, num_cores=2),
           _reference(o6, t6, w_chan))

    # 7) ragged numel (not a multiple of 128) -> padded tail + masked last block.
    shape7 = (2, 3, 11, 13)
    o7 = jax.nn.sigmoid(jax.random.normal(k3, shape7, dtype=jnp.float32))
    t7 = jax.random.uniform(k4, shape7, dtype=jnp.float32)
    _check("ragged", bce_with_weights(o7, t7), _reference(o7, t7))

    print("KERNEL_OK")
</pallas_src>

<mosaic_0001>
module attributes {stable_mosaic.version = 11 : i64} {
  func.func @_bce_kernel_row(%arg0: i32, %arg1: i32, %arg2: memref<16x128xf32, #tpu.memory_space<vmem>>, %arg3: memref<16x128xf32, #tpu.memory_space<vmem>>, %arg4: memref<1x1x16xf32, #tpu.memory_space<vmem>>, %arg5: memref<1x1x128xf32, #tpu.memory_space<vmem>>) attributes {dimension_semantics = [#tpu.dimension_semantics<parallel>, #tpu.dimension_semantics<arbitrary>], iteration_bounds = array<i64: 1, 1>, scalar_prefetch = 0 : i64, scratch_operands = 0 : i64, tpu.core_type = #tpu.core_type<tc>, window_params = [{transform_indices = @transform_0, window_bounds = array<i64: 16, 128>}, {transform_indices = @transform_1, window_bounds = array<i64: 16, 128>}, {transform_indices = @transform_2, window_bounds = array<i64: 1, 1, 16>}, {transform_indices = @transform_3, window_bounds = array<i64: 1, 1, 128>}]} {
    %c0_i32 = arith.constant 0 : i32
    %0 = arith.cmpi eq, %arg1, %c0_i32 : i32
    %1 = arith.extui %0 : i1 to i32
    %c0_i32_0 = arith.constant 0 : i32
    %2 = arith.cmpi ne, %1, %c0_i32_0 : i32
    scf.if %2 {
      %cst_17 = arith.constant 0.000000e+00 : f32
      %25 = vector.broadcast %cst_17 : f32 to vector<1x1x128xf32>
      %c0_18 = arith.constant 0 : index
      %c0_19 = arith.constant 0 : index
      %c0_20 = arith.constant 0 : index
      %26 = vector.load %arg5[%c0_18, %c0_19, %c0_20] : memref<1x1x128xf32, #tpu.memory_space<vmem>>, vector<1x1x128xf32>
      tpu.vector_store %arg5[%c0_18, %c0_19, %c0_20], %25 {strides = array<i32>} : memref<1x1x128xf32, #tpu.memory_space<vmem>>, vector<1x1x128xf32>,
    } else {
    }
    %c0 = arith.constant 0 : index
    %c0_1 = arith.constant 0 : index
    %3 = vector.load %arg2[%c0, %c0_1] : memref<16x128xf32, #tpu.memory_space<vmem>>, vector<16x128xf32>
    %c0_2 = arith.constant 0 : index
    %c0_3 = arith.constant 0 : index
    %4 = vector.load %arg3[%c0_2, %c0_3] : memref<16x128xf32, #tpu.memory_space<vmem>>, vector<16x128xf32>
    %5 = math.log %3 : vector<16x128xf32>
    %cst = arith.constant -1.000000e+02 : f32
    %6 = vector.broadcast %cst : f32 to vector<16x128xf32>
    %7 = arith.maximumf %5, %6 : vector<16x128xf32>
    %cst_4 = arith.constant 0.000000e+00 : f32
    %8 = vector.broadcast %cst_4 : f32 to vector<16x128xf32>
    %9 = arith.subf %8, %3 : vector<16x128xf32>
    %10 = math.log1p %9 : vector<16x128xf32>
    %cst_5 = arith.constant -1.000000e+02 : f32
    %11 = vector.broadcast %cst_5 : f32 to vector<16x128xf32>
    %12 = arith.maximumf %10, %11 : vector<16x128xf32>
    %13 = arith.mulf %4, %7 : vector<16x128xf32>
    %cst_6 = arith.constant 1.000000e+00 : f32
    %14 = vector.broadcast %cst_6 : f32 to vector<16x128xf32>
    %15 = arith.subf %14, %4 : vector<16x128xf32>
    %16 = arith.mulf %15, %12 : vector<16x128xf32>
    %17 = arith.addf %13, %16 : vector<16x128xf32>
    %c0_7 = arith.constant 0 : index
    %c0_8 = arith.constant 0 : index
    %c0_9 = arith.constant 0 : index
    %18 = vector.load %arg4[%c0_7, %c0_8, %c0_9] : memref<1x1x16xf32, #tpu.memory_space<vmem>>, vector<1x1x16xf32>
    %19 = vector.shape_cast %18 : vector<1x1x16xf32> to vector<1x16xf32>
    %cst_10 = arith.constant dense<0.000000e+00> : vector<1x128xf32>
    %20 = tpu.matmul %19, %17, %cst_10 {dimension_numbers = #tpu.dot_dimension_numbers<[1], [0], [0], [1], [0, 0, 1, 1], [], []>} : vector<1x16xf32>, vector<16x128xf32>, vector<1x128xf32> -> vector<1x128xf32>
    %c0_11 = arith.constant 0 : index
    %c0_12 = arith.constant 0 : index
    %c0_13 = arith.constant 0 : index
    %21 = vector.load %arg5[%c0_11, %c0_12, %c0_13] : memref<1x1x128xf32, #tpu.memory_space<vmem>>, vector<1x1x128xf32>
    %22 = vector.shape_cast %20 : vector<1x128xf32> to vector<1x1x128xf32>
    %23 = arith.addf %21, %22 : vector<1x1x128xf32>
    %c0_14 = arith.constant 0 : index
    %c0_15 = arith.constant 0 : index
    %c0_16 = arith.constant 0 : index
    %24 = vector.load %arg5[%c0_14, %c0_15, %c0_16] : memref<1x1x128xf32, #tpu.memory_space<vmem>>, vector<1x1x128xf32>
    tpu.vector_store %arg5[%c0_14, %c0_15, %c0_16], %23 {strides = array<i32>} : memref<1x1x128xf32, #tpu.memory_space<vmem>>, vector<1x1x128xf32>,
    return
  }
  func.func @transform_0(%arg0: i32, %arg1: i32) -> (i32, i32) {
    %c1_i32 = arith.constant 1 : i32
    %0 = arith.muli %arg0, %c1_i32 : i32
    %1 = arith.addi %0, %arg1 : i32
    %c0_i32 = arith.constant 0 : i32
    %2 = arith.minsi %1, %c0_i32 : i32
    %c0_i32_0 = arith.constant 0 : i32
    %c0_i32_1 = arith.constant 0 : i32
    return %2, %c0_i32_0 : i32, i32
  }
  func.func @transform_1(%arg0: i32, %arg1: i32) -> (i32, i32) {
    %c1_i32 = arith.constant 1 : i32
    %0 = arith.muli %arg0, %c1_i32 : i32
    %1 = arith.addi %0, %arg1 : i32
    %c0_i32 = arith.constant 0 : i32
    %2 = arith.minsi %1, %c0_i32 : i32
    %c0_i32_0 = arith.constant 0 : i32
    %c0_i32_1 = arith.constant 0 : i32
    return %2, %c0_i32_0 : i32, i32
  }
  func.func @transform_2(%arg0: i32, %arg1: i32) -> (i32, i32, i32) {
    %c1_i32 = arith.constant 1 : i32
    %0 = arith.muli %arg0, %c1_i32 : i32
    %1 = arith.addi %0, %arg1 : i32
    %c0_i32 = arith.constant 0 : i32
    %2 = arith.minsi %1, %c0_i32 : i32
    %c0_i32_0 = arith.constant 0 : i32
    %c0_i32_1 = arith.constant 0 : i32
    %c0_i32_2 = arith.constant 0 : i32
    return %2, %c0_i32_0, %c0_i32_1 : i32, i32, i32
  }
  func.func @transform_3(%arg0: i32, %arg1: i32) -> (i32, i32, i32) {
    %c0_i32 = arith.constant 0 : i32
    %c0_i32_0 = arith.constant 0 : i32
    %c0_i32_1 = arith.constant 0 : i32
    return %arg0, %c0_i32, %c0_i32_0 : i32, i32, i32
  }
}

</mosaic_0001>

<bundles_post_ra>
// kernel: tpu_custom_call.1
= control target key start
LH: loop header
LB: loop body
LE: loop exit
PB: predicated region body
PF: predicated region fallthrough
CT: control target
= control target key end

     0   :  { %8 = vsyncpa [#allocation3], 0  ;;  %s402_s0 = inlined_call_operand.hbm [shape: f32[16,128], index: 0, kind: input, shape index: {}]   ;;  %s403_s1 = inlined_call_operand.hbm [shape: f32[16,128], index: 1, kind: input, shape index: {}]   ;;  %s404_s2 = inlined_call_operand.vmem [shape: f32[1,1,16], index: 2, kind: input, shape index: {}]   ;;  %s405_s3 = inlined_call_operand.hbm [shape: f32[1,1,128], index: 3, kind: output, shape index: {}]  }
   0x1   :  { %9 = vsyncpa [#allocation6], 0 }
   0x2   :  { %10 = vsyncpa [#allocation4], 0  ;;  %s335_s12 = smov [#allocation2]   ;;  %s263_s16 = scalar_lea.hbm %s402_s0, 256 }
   0x3   :  { %s22_s13 = sshll.u32 %s335_s12, 4  ;;  %p264_p0 = scmp.ne.s32.totalorder %s402_s0, %s263_s16  ;;  %s23_s13 = int_to_ptr.vmem [resolvable:$true] %s22_s13 }
   0x4   :  { %p267_p1 = scmp.lt.u32.totalorder %s263_s16, %s402_s0 }
   0x6   :  { %p269_p2 = pnand %p267_p1, %p264_p0 }
   0x8   :  { %272 = shalt.err (!%p269_p2)
}
   0x9   :  { %s273_s21 = scalar_lea.vmem %s23_s13, 256  ;;  %p278_p4 = scmp.lt.s32.totalorder %s23_s13, %s23_s13 }
   0xa   :  { %p274_p3 = scmp.ne.s32.totalorder %s23_s13, %s273_s21  ;;  %p279_p5 = scmp.lt.s32.totalorder %s273_s21, %s273_s21 }
   0xc   :  { %p280_p6 = por %p279_p5, %p278_p4 }
   0xe   :  { %p281_p7 = pnand %p280_p6, %p274_p3 }
  0x10   :  { %284 = shalt.err (!%p281_p7)
}
  0x11   :  { %s336_s22 = smov 128   ;;  %s337_s23 = smov 8  }
  0x12   :  { %28 = dma.hbm_to_vmem [thread:$0]  %s402_s0, 256, %s23_s13, [#allocation3], %s336_s22, %s336_s22, %s337_s23  }
  0x13   :  { %s338_s26 = smov [#allocation5]   ;;  %s285_s30 = scalar_lea.hbm %s403_s1, 256 }
  0x14   :  { %s40_s27 = sshll.u32 %s338_s26, 4  ;;  %p286_p8 = scmp.ne.s32.totalorder %s403_s1, %s285_s30  ;;  %s41_s27 = int_to_ptr.vmem [resolvable:$true] %s40_s27 }
  0x15   :  { %p289_p9 = scmp.lt.u32.totalorder %s285_s30, %s403_s1 }
  0x17   :  { %p291_p10 = pnand %p289_p9, %p286_p8 }
  0x19   :  { %294 = shalt.err (!%p291_p10)
}
  0x1a   :  { %s295_s8 = scalar_lea.vmem %s41_s27, 256  ;;  %p300_p12 = scmp.lt.s32.totalorder %s41_s27, %s41_s27 }
  0x1b   :  { %p296_p11 = scmp.ne.s32.totalorder %s41_s27, %s295_s8  ;;  %p301_p13 = scmp.lt.s32.totalorder %s295_s8, %s295_s8 }
  0x1d   :  { %p302_p0 = por %p301_p13, %p300_p12 }
  0x1f   :  { %p303_p1 = pnand %p302_p0, %p296_p11 }
  0x21   :  { %306 = shalt.err (!%p303_p1)
}
  0x22   :  { %46 = dma.hbm_to_vmem [thread:$0]  %s403_s1, 256, %s41_s27, [#allocation6], %s336_s22, %s336_s22, %s337_s23  }
  0x23   :  { %329 = dma.done.wait [#allocation3], 256  }
  0x24   :  { %330 = vsyncadd [#allocation3], 4294967040 }
  0x25   :  { %331 = dma.done.wait [#allocation6], 256  }
  0x26   :  { %332 = vsyncadd [#allocation6], 4294967040  ;;  %v339_v0 = vmov 0.0|0.0   ;;  %v340_v1 = vmov 0.0   ;;  %vm341_vm0 = vmmov 0   ;;  %v92_v2 = vld [vmem:[#allocation2] sm:$0xff] }
  0x27   :  { %244 = vmatprep.subr.bf16.mxu0 %v339_v0  ;;  %91 = vst [vmem:[#allocation7] sm:$0x1] %v340_v1  ;;  %241 = vmatprep.mubr.msk.f32.mxu0 %vm341_vm0, %v340_v1  ;;  %v93_v3 = vld [vmem:[#allocation2 + $0x8] sm:$0xff]  ;;  %255 = vlog2.f32 %v92_v2  ;;  %v102_v4 = vsub.f32 0.0, %v92_v2  ;;  %v94_v18 = vld [vmem:[#allocation5] sm:$0xff]  ;;  %v95_v21 = vld [vmem:[#allocation5 + $0x8] sm:$0xff] }
  0x28   :  { %v103_v5 = vsub.f32 0.0, %v93_v3  ;;  %257 = vlog2.f32 %v93_v3  ;;  %v126_v28 = vsub.f32 1.0, %v94_v18  ;;  %v127_v30 = vsub.f32 1.0, %v95_v21  ;;  %v132_v41 = vld [vmem:[%s404_s2] sm:$0x1]  ;;  %s342_s11 = smov [#allocation7]  }
  0x29   :  { %v104_v6 = vadd.f32 1.0, %v102_v4  ;;  %v107_v8 = vmul.f32 -0.5, %v102_v4  ;;  %v110_v12 = vand.u32 2147483647, %v102_v4  ;;  %vm133_vm3 = vcmask 130048   ;;  %s216_s12 = sshll.u32 %s342_s11, 4  ;;  %s217_s12 = int_to_ptr.vmem [resolvable:$true] %s216_s12 }
  0x2a   :  { %v113_v7 = vadd.f32 1.0, %v103_v5  ;;  %v116_v9 = vmul.f32 -0.5, %v103_v5  ;;  %v119_v16 = vand.u32 2147483647, %v103_v5  ;;  %s307_s13 = scalar_lea.vmem %s217_s12, 16  ;;  %s311_s14 = scalar_lea.vmem %s217_s12, 32 }
  0x2b   :  { %259 = vlog2.f32 %v104_v6  ;;  %v108_v10 = vadd.f32 1.0, %v107_v8  ;;  %vm111_vm1 = vcmp.lt.f32.partialorder %v110_v12, 0.0004427343  ;;  %p308_p2 = scmp.ne.s32.totalorder %s217_s12, %s307_s13  ;;  %p312_p3 = scmp.lt.s32.totalorder %s217_s12, %s217_s12 }
  0x2c   :  { %261 = vlog2.f32 %v113_v7  ;;  %v117_v13 = vadd.f32 1.0, %v116_v9  ;;  %vm120_vm2 = vcmp.lt.f32.partialorder %v119_v16, 0.0004427343  ;;  %p313_p4 = scmp.lt.s32.totalorder %s311_s14, %s307_s13 }
  0x2d   :  { %v109_v19 = vmul.f32 %v108_v10, %v102_v4 }
  0x2e   :  { %v118_v23 = vmul.f32 %v117_v13, %v103_v5  ;;  %v207_v42 = vld [vmem:[#allocation7] sm:$0x1]  ;;  %p314_p5 = por %p313_p4, %p312_p3 }
  0x30   :  { %p315_p6 = pnand %p314_p5, %p308_p2 }
  0x31   :  { %v256_v11 = vpop.eup %255 }
  0x32   :  { %v258_v14 = vpop.eup %257  ;;  %v97_v15 = vmul.f32 0.6931472, %v256_v11 }
  0x33   :  { %v99_v17 = vmul.f32 0.6931472, %v258_v14 }
  0x34   :  { %v100_v22 = vmax.f32 %v97_v15, -100.0 }
  0x35   :  { %v260_v20 = vpop.eup %259  ;;  %v101_v25 = vmax.f32 %v99_v17, -100.0 }
  0x36   :  { %v262_v24 = vpop.eup %261  ;;  %v106_v26 = vmul.f32 0.6931472, %v260_v20  ;;  %v124_v33 = vmul.f32 %v100_v22, %v94_v18 }
  0x37   :  { %v115_v27 = vmul.f32 0.6931472, %v262_v24  ;;  %v125_v35 = vmul.f32 %v101_v25, %v95_v21 }
  0x38   :  { %v112_v29 = vsel %vm111_vm1, %v109_v19, %v106_v26 }
  0x39   :  { %v121_v31 = vsel %vm120_vm2, %v118_v23, %v115_v27  ;;  %v122_v32 = vmax.f32 %v112_v29, -100.0 }
  0x3a   :  { %v123_v34 = vmax.f32 %v121_v31, -100.0 }
  0x3b   :  { %v128_v36 = vmul.f32 %v126_v28, %v122_v32 }
  0x3c   :  { %v129_v37 = vmul.f32 %v127_v30, %v123_v34 }
  0x3d   :  { %v130_v38 = vadd.f32 %v128_v36, %v124_v33 }
  0x3e   :  { %v131_v39 = vadd.f32 %v129_v37, %v125_v35 }
  0x40   :  { %v245_v40 = vpack.c.bf16 %v131_v39, %v130_v38 }
  0x42   :  { %246 = vmatpush3.bf16.msra.mxu0 %v245_v40 }
  0x45   :  { %242 = vmatmul.mubr.msk.f32.vlgmr.msra.gmra.mrb[0].mxu0 %vm133_vm3, %v132_v41 }
 0x118   :  { %v203_v43 = vpop.f32.mrb[0].mxu0 }
 0x119   :  { %v208_v44 = vadd.f32 %v207_v42, %v203_v43  ;;  %v243_v45 = vpop.f32.mrb[1].mxu0 }
 0x11b   :  { %209 = vst [vmem:[#allocation7] sm:$0x1] %v208_v44 }
 0x11c   :  { %318 = shalt.err (!%p315_p6)
}
 0x11d   :  { %s319_s16 = scalar_lea.hbm %s405_s3, 16 }
 0x11e   :  { %p320_p7 = scmp.ne.s32.totalorder %s405_s3, %s319_s16  ;;  %p323_p8 = scmp.lt.u32.totalorder %s319_s16, %s405_s3 }
 0x120   :  { %p325_p9 = pnand %p323_p8, %p320_p7 }
 0x122   :  { %328 = shalt.err (!%p325_p9)
}
 0x123   :  { %219 = dma.vmem_to_hbm [thread:$0]  %s217_s12, 16, %s405_s3, [#allocation4]  }
 0x124   :  { %333 = dma.done.wait [#allocation4], 16  }
 0x125   :  { %334 = vsyncadd [#allocation4], 4294967280 }
 0x126   :  { %223 = vsyncpa [#allocation3], 1 }
 0x127   :  { %224 = vsyncpa [#allocation6], 1 }
 0x128   :  { %225 = vsyncpa [#allocation4], 1 }

</bundles_post_ra>
